<compile_context>
chip_gen: v7x
topology: tpu7x:2x2x1
jax: 0.10.0
libtpu: 0.0.40
codegen_flags: <defaults>
</compile_context>

<pallas_src>
import functools

import jax
import jax.numpy as jnp
from jax import lax
from jax.experimental import pallas as pl
from jax.experimental.pallas import tpu as pltpu  # noqa: F401  (memory-space helpers if extended)


def lstm_kernel(x_ref, wih_ref, whh_ref, b_ref, h0_ref, c0_ref, out_ref,
                *, hidden, seq_len, batch_padded):
    """Whole-sequence LSTM recurrence in one kernel invocation.

    x_ref  : (T*Bp, I)  bfloat16, VMEM   (time-major, batch padded, flattened)
    wih_ref: (I, 4H)    bfloat16, VMEM   (W_ih^T, gate order [i, f, o, g], i/f/o cols * 0.5)
    whh_ref: (H, 4H)    bfloat16, VMEM   (W_hh^T, gate order [i, f, o, g], i/f/o cols * 0.5)
    b_ref  : (1, 4H)    float32,  VMEM   (b_ih + b_hh, reordered, i/f/o entries * 0.5)
    h0_ref : (Bp, H)    bfloat16, VMEM
    c0_ref : (Bp, H)    float32,  VMEM
    out_ref: (Bp, H)    float32,  VMEM   (h at last time step)
    """
    H = hidden
    T = seq_len
    Bp = batch_padded

    wih = wih_ref[...]
    whh = whh_ref[...]   # loop-invariant MXU RHS, hoisted above the recurrence
    b = b_ref[...]

    # Hoisted input projection: one big MXU matmul covers every timestep.
    # (T*Bp, I) @ (I, 4H) -> (T*Bp, 4H), f32 accumulation, lane-dense (4H = 128).
    # TODO(synk): for production-scale T, keep xz in bf16 or chunk over time
    # (emit_pipeline) so the buffer fits v7x's smaller VMEM.
    xz = jnp.dot(x_ref[...], wih, preferred_element_type=jnp.float32) + b

    h = h0_ref[...]       # (Bp, H) bf16 carry (only ever consumed by the MXU dot)
    c = c0_ref[...]       # (Bp, H) f32
    h_f32 = c             # overwritten on every iteration (T >= 1)

    # Static unroll: T is small and fixed; all slices below are static.
    # TODO(synk): for larger T switch to lax.fori_loop(..., unroll=4-8) carrying (h, c)
    # to bound live ranges / vreg pressure.
    for t in range(T):
        z = xz[t * Bp:(t + 1) * Bp, :] + jnp.dot(
            h, whh, preferred_element_type=jnp.float32)
        # Sigmoid logits were pre-halved via the weights/bias, so one tanh over the
        # full (Bp, 128) register gives both the sigmoid gates and the g gate:
        #   sigmoid(x) = 0.5 * (tanh(x/2) + 1)
        tz = jnp.tanh(z)                       # EUP push #1 (full 128-lane register)
        s = 0.5 * tz[:, :3 * H] + 0.5          # i, f, o gates (contiguous slice)
        g_g = tz[:, 3 * H:]                    # g gate (already tanh)
        i_g = s[:, 0 * H:1 * H]
        f_g = s[:, 1 * H:2 * H]
        o_g = s[:, 2 * H:3 * H]
        c = f_g * c + i_g * g_g                # f32 cell state
        h_f32 = o_g * jnp.tanh(c)              # EUP push #2
        h = h_f32.astype(jnp.bfloat16)         # bf16 carry for next step's MXU dot

    out_ref[...] = h_f32


def lstm_forward(x, w_ih, w_hh, b_ih, b_hh, h0, c0):
    """x: (B, T, I). Returns h_T: (B, H) == output[:, -1, :] of the PyTorch module."""
    B, T, I = x.shape
    H = w_hh.shape[1]
    Bp = ((B + 7) // 8) * 8  # pad batch to sublane width

    # Reorder gate blocks from PyTorch's [i, f, g, o] to [i, f, o, g] so the sigmoid
    # gates are one contiguous 3H slice, then pre-scale the sigmoid rows by 0.5
    # (exact in bf16: exponent decrement) to fold the tanh-based sigmoid's x/2.
    perm = jnp.concatenate([
        jnp.arange(0 * H, 1 * H),
        jnp.arange(1 * H, 2 * H),
        jnp.arange(3 * H, 4 * H),
        jnp.arange(2 * H, 3 * H),
    ])
    gate_scale = jnp.concatenate([jnp.full((3 * H,), 0.5, jnp.float32),
                                  jnp.ones((H,), jnp.float32)])

    wih_r = w_ih[perm] * gate_scale[:, None]                         # (4H, I)
    whh_r = w_hh[perm] * gate_scale[:, None]                         # (4H, H)
    wih_t = jnp.transpose(wih_r).astype(jnp.bfloat16)                # (I, 4H)
    whh_t = jnp.transpose(whh_r).astype(jnp.bfloat16)                # (H, 4H)
    bias = ((b_ih + b_hh)[perm] * gate_scale).astype(jnp.float32)[None, :]   # (1, 4H)

    # Time-major, batch-padded, flattened input in bf16 for the MXU.
    x_tm = jnp.transpose(x, (1, 0, 2))                               # (T, B, I)
    x_tm = jnp.pad(x_tm, ((0, 0), (0, Bp - B), (0, 0)))              # (T, Bp, I)
    x_flat = x_tm.reshape(T * Bp, I).astype(jnp.bfloat16)            # (T*Bp, I)

    h0_p = jnp.pad(h0, ((0, Bp - B), (0, 0))).astype(jnp.bfloat16)   # (Bp, H) bf16 carry
    c0_p = jnp.pad(c0.astype(jnp.float32), ((0, Bp - B), (0, 0)))    # (Bp, H) f32

    full = lambda shape: pl.BlockSpec(shape, lambda: tuple(0 for _ in shape))

    # TODO(synk): for large B on v7x, add a 'parallel' batch-tile grid axis so the
    # second TensorCore is used and size tiles for its 64 MiB VMEM; at B=2 (padded
    # to 8) a single invocation is optimal and launch-overhead dominated.
    out_p = pl.pallas_call(
        functools.partial(lstm_kernel, hidden=H, seq_len=T, batch_padded=Bp),
        out_shape=jax.ShapeDtypeStruct((Bp, H), jnp.float32),
        in_specs=[
            full((T * Bp, I)),
            full((I, 4 * H)),
            full((H, 4 * H)),
            full((1, 4 * H)),
            full((Bp, H)),
            full((Bp, H)),
        ],
        out_specs=full((Bp, H)),
    )(x_flat, wih_t, whh_t, bias, h0_p, c0_p)

    return out_p[:B]


def lstm_reference(x, w_ih, w_hh, b_ih, b_hh, h0, c0):
    """Pure-JAX f32 reference of PyTorch nn.LSTM (1 layer, batch_first)."""
    H = w_hh.shape[1]

    def step(carry, x_t):
        h, c = carry
        z = x_t @ w_ih.T + h @ w_hh.T + b_ih + b_hh
        i_g = jax.nn.sigmoid(z[:, 0 * H:1 * H])
        f_g = jax.nn.sigmoid(z[:, 1 * H:2 * H])
        g_g = jnp.tanh(z[:, 2 * H:3 * H])
        o_g = jax.nn.sigmoid(z[:, 3 * H:4 * H])
        c = f_g * c + i_g * g_g
        h = o_g * jnp.tanh(c)
        return (h, c), h

    (h_last, _), _ = lax.scan(step, (h0, c0), jnp.transpose(x, (1, 0, 2)))
    return h_last


if __name__ == "__main__":
    # Small shapes consistent with the module's forward.
    B, T, n_input, n_outputs = 2, 8, 16, 32

    key = jax.random.PRNGKey(0)
    k_x, k_wih, k_whh, k_bih, k_bhh, k_h0, k_c0 = jax.random.split(key, 7)

    # Deterministic parameter init (PyTorch nn.LSTM uses U(-1/sqrt(H), 1/sqrt(H))).
    bound = 1.0 / jnp.sqrt(jnp.float32(n_outputs))
    w_ih = jax.random.uniform(k_wih, (4 * n_outputs, n_input), jnp.float32, -bound, bound)
    w_hh = jax.random.uniform(k_whh, (4 * n_outputs, n_outputs), jnp.float32, -bound, bound)
    b_ih = jax.random.uniform(k_bih, (4 * n_outputs,), jnp.float32, -bound, bound)
    b_hh = jax.random.uniform(k_bhh, (4 * n_outputs,), jnp.float32, -bound, bound)

    x = jax.random.normal(k_x, (B, T, n_input), jnp.float32)
    # The PyTorch module draws fresh random h0/c0 each forward; here we draw them
    # deterministically once from the PRNG (shape (1, B, H) squeezed to (B, H)).
    h0 = jax.random.normal(k_h0, (B, n_outputs), jnp.float32)
    c0 = jax.random.normal(k_c0, (B, n_outputs), jnp.float32)

    out = lstm_forward(x, w_ih, w_hh, b_ih, b_hh, h0, c0)
    out = jax.block_until_ready(out)

    ref = lstm_reference(x, w_ih, w_hh, b_ih, b_hh, h0, c0)
    assert out.shape == (B, n_outputs)
    # bf16 weights/activations on the MXU -> compare against f32 reference with a
    # looser tolerance.
    max_err = float(jnp.max(jnp.abs(out - ref)))
    assert jnp.allclose(out, ref, atol=2e-2, rtol=2e-2), f"mismatch vs reference (max_err={max_err})"

    print("KERNEL_OK")
</pallas_src>

<mosaic_0001>
module attributes {stable_mosaic.version = 11 : i64} {
  func.func @lstm_kernel(%arg0: memref<64x16xbf16, #tpu.memory_space<vmem>>, %arg1: memref<16x128xbf16, #tpu.memory_space<vmem>>, %arg2: memref<32x128xbf16, #tpu.memory_space<vmem>>, %arg3: memref<1x128xf32, #tpu.memory_space<vmem>>, %arg4: memref<8x32xbf16, #tpu.memory_space<vmem>>, %arg5: memref<8x32xf32, #tpu.memory_space<vmem>>, %arg6: memref<8x32xf32, #tpu.memory_space<vmem>>) attributes {dimension_semantics = [], scalar_prefetch = 0 : i64, scratch_operands = 0 : i64, tpu.core_type = #tpu.core_type<tc>} {
    %c0 = arith.constant 0 : index
    %c0_0 = arith.constant 0 : index
    %0 = vector.load %arg1[%c0, %c0_0] : memref<16x128xbf16, #tpu.memory_space<vmem>>, vector<16x128xbf16>
    %c0_1 = arith.constant 0 : index
    %c0_2 = arith.constant 0 : index
    %1 = vector.load %arg2[%c0_1, %c0_2] : memref<32x128xbf16, #tpu.memory_space<vmem>>, vector<32x128xbf16>
    %c0_3 = arith.constant 0 : index
    %c0_4 = arith.constant 0 : index
    %2 = vector.load %arg3[%c0_3, %c0_4] : memref<1x128xf32, #tpu.memory_space<vmem>>, vector<1x128xf32>
    %c0_5 = arith.constant 0 : index
    %c0_6 = arith.constant 0 : index
    %3 = vector.load %arg0[%c0_5, %c0_6] : memref<64x16xbf16, #tpu.memory_space<vmem>>, vector<64x16xbf16>
    %cst = arith.constant dense<0.000000e+00> : vector<64x128xf32>
    %4 = tpu.matmul %3, %0, %cst {dimension_numbers = #tpu.dot_dimension_numbers<[1], [0], [0], [1], [0, 0, 1, 1], [], []>} : vector<64x16xbf16>, vector<16x128xbf16>, vector<64x128xf32> -> vector<64x128xf32>
    %5 = vector.broadcast %2 : vector<1x128xf32> to vector<64x128xf32>
    %6 = arith.addf %4, %5 : vector<64x128xf32>
    %c0_7 = arith.constant 0 : index
    %c0_8 = arith.constant 0 : index
    %7 = vector.load %arg4[%c0_7, %c0_8] : memref<8x32xbf16, #tpu.memory_space<vmem>>, vector<8x32xbf16>
    %c0_9 = arith.constant 0 : index
    %c0_10 = arith.constant 0 : index
    %8 = vector.load %arg5[%c0_9, %c0_10] : memref<8x32xf32, #tpu.memory_space<vmem>>, vector<8x32xf32>
    %9 = vector.extract_strided_slice %6 {offsets = [0, 0], sizes = [8, 128], strides = [1, 1]} : vector<64x128xf32> to vector<8x128xf32>
    %cst_11 = arith.constant dense<0.000000e+00> : vector<8x128xf32>
    %10 = tpu.matmul %7, %1, %cst_11 {dimension_numbers = #tpu.dot_dimension_numbers<[1], [0], [0], [1], [0, 0, 1, 1], [], []>} : vector<8x32xbf16>, vector<32x128xbf16>, vector<8x128xf32> -> vector<8x128xf32>
    %11 = arith.addf %9, %10 : vector<8x128xf32>
    %12 = math.tanh %11 : vector<8x128xf32>
    %13 = vector.extract_strided_slice %12 {offsets = [0, 0], sizes = [8, 96], strides = [1, 1]} : vector<8x128xf32> to vector<8x96xf32>
    %cst_12 = arith.constant 5.000000e-01 : f32
    %14 = vector.broadcast %cst_12 : f32 to vector<8x96xf32>
    %15 = arith.mulf %14, %13 : vector<8x96xf32>
    %cst_13 = arith.constant 5.000000e-01 : f32
    %16 = vector.broadcast %cst_13 : f32 to vector<8x96xf32>
    %17 = arith.addf %15, %16 : vector<8x96xf32>
    %18 = vector.extract_strided_slice %12 {offsets = [0, 96], sizes = [8, 32], strides = [1, 1]} : vector<8x128xf32> to vector<8x32xf32>
    %19 = vector.extract_strided_slice %17 {offsets = [0, 0], sizes = [8, 32], strides = [1, 1]} : vector<8x96xf32> to vector<8x32xf32>
    %20 = vector.extract_strided_slice %17 {offsets = [0, 32], sizes = [8, 32], strides = [1, 1]} : vector<8x96xf32> to vector<8x32xf32>
    %21 = vector.extract_strided_slice %17 {offsets = [0, 64], sizes = [8, 32], strides = [1, 1]} : vector<8x96xf32> to vector<8x32xf32>
    %22 = arith.mulf %20, %8 : vector<8x32xf32>
    %23 = arith.mulf %19, %18 : vector<8x32xf32>
    %24 = arith.addf %22, %23 : vector<8x32xf32>
    %25 = math.tanh %24 : vector<8x32xf32>
    %26 = arith.mulf %21, %25 : vector<8x32xf32>
    %27 = arith.truncf %26 : vector<8x32xf32> to vector<8x32xbf16>
    %28 = vector.extract_strided_slice %6 {offsets = [8, 0], sizes = [8, 128], strides = [1, 1]} : vector<64x128xf32> to vector<8x128xf32>
    %cst_14 = arith.constant dense<0.000000e+00> : vector<8x128xf32>
    %29 = tpu.matmul %27, %1, %cst_14 {dimension_numbers = #tpu.dot_dimension_numbers<[1], [0], [0], [1], [0, 0, 1, 1], [], []>} : vector<8x32xbf16>, vector<32x128xbf16>, vector<8x128xf32> -> vector<8x128xf32>
    %30 = arith.addf %28, %29 : vector<8x128xf32>
    %31 = math.tanh %30 : vector<8x128xf32>
    %32 = vector.extract_strided_slice %31 {offsets = [0, 0], sizes = [8, 96], strides = [1, 1]} : vector<8x128xf32> to vector<8x96xf32>
    %cst_15 = arith.constant 5.000000e-01 : f32
    %33 = vector.broadcast %cst_15 : f32 to vector<8x96xf32>
    %34 = arith.mulf %33, %32 : vector<8x96xf32>
    %cst_16 = arith.constant 5.000000e-01 : f32
    %35 = vector.broadcast %cst_16 : f32 to vector<8x96xf32>
    %36 = arith.addf %34, %35 : vector<8x96xf32>
    %37 = vector.extract_strided_slice %31 {offsets = [0, 96], sizes = [8, 32], strides = [1, 1]} : vector<8x128xf32> to vector<8x32xf32>
    %38 = vector.extract_strided_slice %36 {offsets = [0, 0], sizes = [8, 32], strides = [1, 1]} : vector<8x96xf32> to vector<8x32xf32>
    %39 = vector.extract_strided_slice %36 {offsets = [0, 32], sizes = [8, 32], strides = [1, 1]} : vector<8x96xf32> to vector<8x32xf32>
    %40 = vector.extract_strided_slice %36 {offsets = [0, 64], sizes = [8, 32], strides = [1, 1]} : vector<8x96xf32> to vector<8x32xf32>
    %41 = arith.mulf %39, %24 : vector<8x32xf32>
    %42 = arith.mulf %38, %37 : vector<8x32xf32>
    %43 = arith.addf %41, %42 : vector<8x32xf32>
    %44 = math.tanh %43 : vector<8x32xf32>
    %45 = arith.mulf %40, %44 : vector<8x32xf32>
    %46 = arith.truncf %45 : vector<8x32xf32> to vector<8x32xbf16>
    %47 = vector.extract_strided_slice %6 {offsets = [16, 0], sizes = [8, 128], strides = [1, 1]} : vector<64x128xf32> to vector<8x128xf32>
    %cst_17 = arith.constant dense<0.000000e+00> : vector<8x128xf32>
    %48 = tpu.matmul %46, %1, %cst_17 {dimension_numbers = #tpu.dot_dimension_numbers<[1], [0], [0], [1], [0, 0, 1, 1], [], []>} : vector<8x32xbf16>, vector<32x128xbf16>, vector<8x128xf32> -> vector<8x128xf32>
    %49 = arith.addf %47, %48 : vector<8x128xf32>
    %50 = math.tanh %49 : vector<8x128xf32>
    %51 = vector.extract_strided_slice %50 {offsets = [0, 0], sizes = [8, 96], strides = [1, 1]} : vector<8x128xf32> to vector<8x96xf32>
    %cst_18 = arith.constant 5.000000e-01 : f32
    %52 = vector.broadcast %cst_18 : f32 to vector<8x96xf32>
    %53 = arith.mulf %52, %51 : vector<8x96xf32>
    %cst_19 = arith.constant 5.000000e-01 : f32
    %54 = vector.broadcast %cst_19 : f32 to vector<8x96xf32>
    %55 = arith.addf %53, %54 : vector<8x96xf32>
    %56 = vector.extract_strided_slice %50 {offsets = [0, 96], sizes = [8, 32], strides = [1, 1]} : vector<8x128xf32> to vector<8x32xf32>
    %57 = vector.extract_strided_slice %55 {offsets = [0, 0], sizes = [8, 32], strides = [1, 1]} : vector<8x96xf32> to vector<8x32xf32>
    %58 = vector.extract_strided_slice %55 {offsets = [0, 32], sizes = [8, 32], strides = [1, 1]} : vector<8x96xf32> to vector<8x32xf32>
    %59 = vector.extract_strided_slice %55 {offsets = [0, 64], sizes = [8, 32], strides = [1, 1]} : vector<8x96xf32> to vector<8x32xf32>
    %60 = arith.mulf %58, %43 : vector<8x32xf32>
    %61 = arith.mulf %57, %56 : vector<8x32xf32>
    %62 = arith.addf %60, %61 : vector<8x32xf32>
    %63 = math.tanh %62 : vector<8x32xf32>
    %64 = arith.mulf %59, %63 : vector<8x32xf32>
    %65 = arith.truncf %64 : vector<8x32xf32> to vector<8x32xbf16>
    %66 = vector.extract_strided_slice %6 {offsets = [24, 0], sizes = [8, 128], strides = [1, 1]} : vector<64x128xf32> to vector<8x128xf32>
    %cst_20 = arith.constant dense<0.000000e+00> : vector<8x128xf32>
    %67 = tpu.matmul %65, %1, %cst_20 {dimension_numbers = #tpu.dot_dimension_numbers<[1], [0], [0], [1], [0, 0, 1, 1], [], []>} : vector<8x32xbf16>, vector<32x128xbf16>, vector<8x128xf32> -> vector<8x128xf32>
    %68 = arith.addf %66, %67 : vector<8x128xf32>
    %69 = math.tanh %68 : vector<8x128xf32>
    %70 = vector.extract_strided_slice %69 {offsets = [0, 0], sizes = [8, 96], strides = [1, 1]} : vector<8x128xf32> to vector<8x96xf32>
    %cst_21 = arith.constant 5.000000e-01 : f32
    %71 = vector.broadcast %cst_21 : f32 to vector<8x96xf32>
    %72 = arith.mulf %71, %70 : vector<8x96xf32>
    %cst_22 = arith.constant 5.000000e-01 : f32
    %73 = vector.broadcast %cst_22 : f32 to vector<8x96xf32>
    %74 = arith.addf %72, %73 : vector<8x96xf32>
    %75 = vector.extract_strided_slice %69 {offsets = [0, 96], sizes = [8, 32], strides = [1, 1]} : vector<8x128xf32> to vector<8x32xf32>
    %76 = vector.extract_strided_slice %74 {offsets = [0, 0], sizes = [8, 32], strides = [1, 1]} : vector<8x96xf32> to vector<8x32xf32>
    %77 = vector.extract_strided_slice %74 {offsets = [0, 32], sizes = [8, 32], strides = [1, 1]} : vector<8x96xf32> to vector<8x32xf32>
    %78 = vector.extract_strided_slice %74 {offsets = [0, 64], sizes = [8, 32], strides = [1, 1]} : vector<8x96xf32> to vector<8x32xf32>
    %79 = arith.mulf %77, %62 : vector<8x32xf32>
    %80 = arith.mulf %76, %75 : vector<8x32xf32>
    %81 = arith.addf %79, %80 : vector<8x32xf32>
    %82 = math.tanh %81 : vector<8x32xf32>
    %83 = arith.mulf %78, %82 : vector<8x32xf32>
    %84 = arith.truncf %83 : vector<8x32xf32> to vector<8x32xbf16>
    %85 = vector.extract_strided_slice %6 {offsets = [32, 0], sizes = [8, 128], strides = [1, 1]} : vector<64x128xf32> to vector<8x128xf32>
    %cst_23 = arith.constant dense<0.000000e+00> : vector<8x128xf32>
    %86 = tpu.matmul %84, %1, %cst_23 {dimension_numbers = #tpu.dot_dimension_numbers<[1], [0], [0], [1], [0, 0, 1, 1], [], []>} : vector<8x32xbf16>, vector<32x128xbf16>, vector<8x128xf32> -> vector<8x128xf32>
    %87 = arith.addf %85, %86 : vector<8x128xf32>
    %88 = math.tanh %87 : vector<8x128xf32>
    %89 = vector.extract_strided_slice %88 {offsets = [0, 0], sizes = [8, 96], strides = [1, 1]} : vector<8x128xf32> to vector<8x96xf32>
    %cst_24 = arith.constant 5.000000e-01 : f32
    %90 = vector.broadcast %cst_24 : f32 to vector<8x96xf32>
    %91 = arith.mulf %90, %89 : vector<8x96xf32>
    %cst_25 = arith.constant 5.000000e-01 : f32
    %92 = vector.broadcast %cst_25 : f32 to vector<8x96xf32>
    %93 = arith.addf %91, %92 : vector<8x96xf32>
    %94 = vector.extract_strided_slice %88 {offsets = [0, 96], sizes = [8, 32], strides = [1, 1]} : vector<8x128xf32> to vector<8x32xf32>
    %95 = vector.extract_strided_slice %93 {offsets = [0, 0], sizes = [8, 32], strides = [1, 1]} : vector<8x96xf32> to vector<8x32xf32>
    %96 = vector.extract_strided_slice %93 {offsets = [0, 32], sizes = [8, 32], strides = [1, 1]} : vector<8x96xf32> to vector<8x32xf32>
    %97 = vector.extract_strided_slice %93 {offsets = [0, 64], sizes = [8, 32], strides = [1, 1]} : vector<8x96xf32> to vector<8x32xf32>
    %98 = arith.mulf %96, %81 : vector<8x32xf32>
    %99 = arith.mulf %95, %94 : vector<8x32xf32>
    %100 = arith.addf %98, %99 : vector<8x32xf32>
    %101 = math.tanh %100 : vector<8x32xf32>
    %102 = arith.mulf %97, %101 : vector<8x32xf32>
    %103 = arith.truncf %102 : vector<8x32xf32> to vector<8x32xbf16>
    %104 = vector.extract_strided_slice %6 {offsets = [40, 0], sizes = [8, 128], strides = [1, 1]} : vector<64x128xf32> to vector<8x128xf32>
    %cst_26 = arith.constant dense<0.000000e+00> : vector<8x128xf32>
    %105 = tpu.matmul %103, %1, %cst_26 {dimension_numbers = #tpu.dot_dimension_numbers<[1], [0], [0], [1], [0, 0, 1, 1], [], []>} : vector<8x32xbf16>, vector<32x128xbf16>, vector<8x128xf32> -> vector<8x128xf32>
    %106 = arith.addf %104, %105 : vector<8x128xf32>
    %107 = math.tanh %106 : vector<8x128xf32>
    %108 = vector.extract_strided_slice %107 {offsets = [0, 0], sizes = [8, 96], strides = [1, 1]} : vector<8x128xf32> to vector<8x96xf32>
    %cst_27 = arith.constant 5.000000e-01 : f32
    %109 = vector.broadcast %cst_27 : f32 to vector<8x96xf32>
    %110 = arith.mulf %109, %108 : vector<8x96xf32>
    %cst_28 = arith.constant 5.000000e-01 : f32
    %111 = vector.broadcast %cst_28 : f32 to vector<8x96xf32>
    %112 = arith.addf %110, %111 : vector<8x96xf32>
    %113 = vector.extract_strided_slice %107 {offsets = [0, 96], sizes = [8, 32], strides = [1, 1]} : vector<8x128xf32> to vector<8x32xf32>
    %114 = vector.extract_strided_slice %112 {offsets = [0, 0], sizes = [8, 32], strides = [1, 1]} : vector<8x96xf32> to vector<8x32xf32>
    %115 = vector.extract_strided_slice %112 {offsets = [0, 32], sizes = [8, 32], strides = [1, 1]} : vector<8x96xf32> to vector<8x32xf32>
    %116 = vector.extract_strided_slice %112 {offsets = [0, 64], sizes = [8, 32], strides = [1, 1]} : vector<8x96xf32> to vector<8x32xf32>
    %117 = arith.mulf %115, %100 : vector<8x32xf32>
    %118 = arith.mulf %114, %113 : vector<8x32xf32>
    %119 = arith.addf %117, %118 : vector<8x32xf32>
    %120 = math.tanh %119 : vector<8x32xf32>
    %121 = arith.mulf %116, %120 : vector<8x32xf32>
    %122 = arith.truncf %121 : vector<8x32xf32> to vector<8x32xbf16>
    %123 = vector.extract_strided_slice %6 {offsets = [48, 0], sizes = [8, 128], strides = [1, 1]} : vector<64x128xf32> to vector<8x128xf32>
    %cst_29 = arith.constant dense<0.000000e+00> : vector<8x128xf32>
    %124 = tpu.matmul %122, %1, %cst_29 {dimension_numbers = #tpu.dot_dimension_numbers<[1], [0], [0], [1], [0, 0, 1, 1], [], []>} : vector<8x32xbf16>, vector<32x128xbf16>, vector<8x128xf32> -> vector<8x128xf32>
    %125 = arith.addf %123, %124 : vector<8x128xf32>
    %126 = math.tanh %125 : vector<8x128xf32>
    %127 = vector.extract_strided_slice %126 {offsets = [0, 0], sizes = [8, 96], strides = [1, 1]} : vector<8x128xf32> to vector<8x96xf32>
    %cst_30 = arith.constant 5.000000e-01 : f32
    %128 = vector.broadcast %cst_30 : f32 to vector<8x96xf32>
    %129 = arith.mulf %128, %127 : vector<8x96xf32>
    %cst_31 = arith.constant 5.000000e-01 : f32
    %130 = vector.broadcast %cst_31 : f32 to vector<8x96xf32>
    %131 = arith.addf %129, %130 : vector<8x96xf32>
    %132 = vector.extract_strided_slice %126 {offsets = [0, 96], sizes = [8, 32], strides = [1, 1]} : vector<8x128xf32> to vector<8x32xf32>
    %133 = vector.extract_strided_slice %131 {offsets = [0, 0], sizes = [8, 32], strides = [1, 1]} : vector<8x96xf32> to vector<8x32xf32>
    %134 = vector.extract_strided_slice %131 {offsets = [0, 32], sizes = [8, 32], strides = [1, 1]} : vector<8x96xf32> to vector<8x32xf32>
    %135 = vector.extract_strided_slice %131 {offsets = [0, 64], sizes = [8, 32], strides = [1, 1]} : vector<8x96xf32> to vector<8x32xf32>
    %136 = arith.mulf %134, %119 : vector<8x32xf32>
    %137 = arith.mulf %133, %132 : vector<8x32xf32>
    %138 = arith.addf %136, %137 : vector<8x32xf32>
    %139 = math.tanh %138 : vector<8x32xf32>
    %140 = arith.mulf %135, %139 : vector<8x32xf32>
    %141 = arith.truncf %140 : vector<8x32xf32> to vector<8x32xbf16>
    %142 = vector.extract_strided_slice %6 {offsets = [56, 0], sizes = [8, 128], strides = [1, 1]} : vector<64x128xf32> to vector<8x128xf32>
    %cst_32 = arith.constant dense<0.000000e+00> : vector<8x128xf32>
    %143 = tpu.matmul %141, %1, %cst_32 {dimension_numbers = #tpu.dot_dimension_numbers<[1], [0], [0], [1], [0, 0, 1, 1], [], []>} : vector<8x32xbf16>, vector<32x128xbf16>, vector<8x128xf32> -> vector<8x128xf32>
    %144 = arith.addf %142, %143 : vector<8x128xf32>
    %145 = math.tanh %144 : vector<8x128xf32>
    %146 = vector.extract_strided_slice %145 {offsets = [0, 0], sizes = [8, 96], strides = [1, 1]} : vector<8x128xf32> to vector<8x96xf32>
    %cst_33 = arith.constant 5.000000e-01 : f32
    %147 = vector.broadcast %cst_33 : f32 to vector<8x96xf32>
    %148 = arith.mulf %147, %146 : vector<8x96xf32>
    %cst_34 = arith.constant 5.000000e-01 : f32
    %149 = vector.broadcast %cst_34 : f32 to vector<8x96xf32>
    %150 = arith.addf %148, %149 : vector<8x96xf32>
    %151 = vector.extract_strided_slice %145 {offsets = [0, 96], sizes = [8, 32], strides = [1, 1]} : vector<8x128xf32> to vector<8x32xf32>
    %152 = vector.extract_strided_slice %150 {offsets = [0, 0], sizes = [8, 32], strides = [1, 1]} : vector<8x96xf32> to vector<8x32xf32>
    %153 = vector.extract_strided_slice %150 {offsets = [0, 32], sizes = [8, 32], strides = [1, 1]} : vector<8x96xf32> to vector<8x32xf32>
    %154 = vector.extract_strided_slice %150 {offsets = [0, 64], sizes = [8, 32], strides = [1, 1]} : vector<8x96xf32> to vector<8x32xf32>
    %155 = arith.mulf %153, %138 : vector<8x32xf32>
    %156 = arith.mulf %152, %151 : vector<8x32xf32>
    %157 = arith.addf %155, %156 : vector<8x32xf32>
    %158 = math.tanh %157 : vector<8x32xf32>
    %159 = arith.mulf %154, %158 : vector<8x32xf32>
    %c0_35 = arith.constant 0 : index
    %c0_36 = arith.constant 0 : index
    %160 = vector.load %arg6[%c0_35, %c0_36] : memref<8x32xf32, #tpu.memory_space<vmem>>, vector<8x32xf32>
    tpu.vector_store %arg6[%c0_35, %c0_36], %159 {strides = array<i32>} : memref<8x32xf32, #tpu.memory_space<vmem>>, vector<8x32xf32>,
    return
  }
}

</mosaic_0001>

<bundles_post_ra>
// kernel: tpu_custom_call.1
= control target key start
LH: loop header
LB: loop body
LE: loop exit
PB: predicated region body
PF: predicated region fallthrough
CT: control target
= control target key end

     0   :  { %v919_v1 = vmov 0.0   ;;  %vm72_vm0 = vcmask 130048   ;;  %vm920_vm1 = vmmov 0   ;;  %s1127_s0 = inlined_call_operand.vmem [shape: bf16[64,16], index: 0, kind: input, shape index: {}]   ;;  %s1128_s1 = inlined_call_operand.vmem [shape: bf16[16,128], index: 1, kind: input, shape index: {}]   ;;  %s1129_s2 = inlined_call_operand.vmem [shape: bf16[32,128], index: 2, kind: input, shape index: {}]   ;;  %s1130_s3 = inlined_call_operand.vmem [shape: f32[1,128], index: 3, kind: input, shape index: {}]   ;;  %s1131_s4 = inlined_call_operand.vmem [shape: bf16[8,32], index: 4, kind: input, shape index: {}]   ;;  %s1132_s5 = inlined_call_operand.vmem [shape: f32[8,32], index: 5, kind: input, shape index: {}]   ;;  %s1133_s6 = inlined_call_operand.hbm [shape: f32[8,32], index: 6, kind: output, shape index: {}]  }
   0x1   :  { %v856_v0 = vld [vmem:[%s1128_s1] sm:$0xff]   ;;  %787 = vmatprep.subr.bf16.mxu1 %v919_v1  ;;  %v859_v4 = vld [vmem:[%s1127_s0 + $0x8] sm:$0xff]   ;;  %791 = vmatprep.mubr.msk.bf16.mxu1 %vm920_vm1, %v919_v1 }
   0x2   :  { %v966_v2 = vld [vmem:[%s1129_s2] sm:$0xff]   ;;  %777 = vmatprep.subr.bf16.mxu0 %v856_v0  ;;  %v980_v5 = vld [vmem:[%s1129_s2 + $0x8] sm:$0xff]  }
   0x3   :  { %v858_v3 = vld [vmem:[%s1127_s0] sm:$0xff]   ;;  %788 = vmatpush3.bf16.msra.mxu1 %v966_v2  ;;  %778 = vmatpush3.bf16.msra.mxu0 %v856_v0 }
   0x4   :  { %779 = vmatprep.mubr.msk.bf16.mxu0 %vm72_vm0, %v858_v3  ;;  %789 = vmatprep.subr.bf16.mxu1 %v919_v1 }
   0x5   :  { %803 = vmatprep.subr.bf16.mxu0 %v919_v1 }
   0x6   :  { %780 = vmatmul.mubr.msk.bf16.vlgmr.msra.gmra.mrb[0].mxu0 %vm72_vm0, %v859_v4 }
   0x7   :  { %11 = vsyncpa [#allocation3], 0  ;;  %790 = vmatpush3.bf16.msra.mxu1 %v980_v5  ;;  %v150_v6 = vld [vmem:[%s1131_s4] sm:$0xf]  ;;  %vm164_vm2 = vcmask 261120   ;;  %804 = vmatpush3.bf16.msra.mxu0 %v966_v2  ;;  %s921_s8 = smov 32  }
   0x8   :  { %795 = vmatprep.subr.bf16.mxu1 %v919_v1  ;;  %805 = vmatprep.subr.bf16.mxu0 %v919_v1  ;;  %v1005_v7 = vld [vmem:[%s1130_s3] ss:$0 sm:$0xff]  ;;  %v861_v47 = vld [vmem:[%s1127_s0 + $0x10] sm:$0xff]   ;;  %v862_v48 = vld [vmem:[%s1127_s0 + $0x18] sm:$0xff]   ;;  %s923_s0 = smov [#allocation2]  }
   0x9   :  { %v151_v19 = vld [vmem:[%s1132_s5] sm:$0xff]  ;;  %s922_s5 = smov 64   ;;  %783 = vmatprep.mubr.msk.bf16.mxu0 %vm72_vm0, %v861_v47  ;;  %s720_s14 = sshll.u32 %s923_s0, 4  ;;  %s721_s14 = int_to_ptr.vmem [resolvable:$true] %s720_s14 }
   0xa   :  { %792 = vmatmul.mubr.msk.bf16.vlgmr.msra.gmra.mrb[0].mxu1 %vm164_vm2, %v150_v6  ;;  %s895_s15 = scalar_lea.vmem %s721_s14, 128  ;;  %p900_p1 = scmp.lt.s32.totalorder %s721_s14, %s721_s14 }
   0xb   :  { %796 = vmatpush3.bf16.msra.mxu1 %v966_v2  ;;  %799 = vmatprep.mubr.msk.bf16.mxu1 %vm920_vm1, %v919_v1  ;;  %p896_p0 = scmp.ne.s32.totalorder %s721_s14, %s895_s15  ;;  %p901_p2 = scmp.lt.s32.totalorder %s895_s15, %s895_s15 }
   0xc   :  { %797 = vmatprep.subr.bf16.mxu1 %v919_v1  ;;  %806 = vmatpush3.bf16.msra.mxu0 %v980_v5 }
   0xd   :  { %819 = vmatprep.subr.bf16.mxu0 %v919_v1  ;;  %p902_p3 = por %p901_p2, %p900_p1 }
   0xe   :  { %784 = vmatmul.mubr.msk.bf16.gmra.mrb[4].mxu0 %vm72_vm0, %v862_v48 }
   0xf   :  { %798 = vmatpush3.bf16.msra.mxu1 %v980_v5  ;;  %807 = vmatprep.mubr.msk.bf16.mxu0 %vm920_vm1, %v919_v1  ;;  %p903_p4 = pnand %p902_p3, %p896_p0 }
  0x10   :  { %811 = vmatprep.subr.bf16.mxu1 %v919_v1 }
  0xd9   :  { %v1007_v8 = vpop.f32.mrb[0].mxu0 }
  0xda   :  { %v119_v9 = vpop.f32.mrb[1].mxu0  ;;  %v128_v58 = vadd.f32 %v1007_v8, %v1005_v7 }
  0xdb   :  { %v120_v10 = vadd.f32 %v1005_v7, %v119_v9  ;;  %v1010_v11 = vpop.f32.mrb[2].mxu0 }
  0xdc   :  { %v122_v12 = vpop.f32.mrb[3].mxu0 }
  0xdd   :  { %v202_v13 = vpop.f32.mrb[0].mxu1  ;;  %v123_v33 = vadd.f32 %v1005_v7, %v122_v12 }
  0xde   :  { %v208_v14 = vadd.f32 %v202_v13, %v120_v10  ;;  %v793_v15 = vpop.f32.mrb[1].mxu1 }
  0xdf   :  { %v205_v16 = vpop.f32.mrb[2].mxu1 }
  0xe0   :  { %863 = vtanh.f32 %v208_v14  ;;  %v794_v17 = vpop.f32.mrb[3].mxu1 }
  0xe1   :  { %v1042_v53 = vpop.f32.mrb[4].mxu0 }
  0xe2   :  { %v1044_v54 = vpop.f32.mrb[5].mxu0 }
  0xe3   :  { %v1046_v55 = vpop.f32.mrb[6].mxu0 }
  0xe4   :  { %v1048_v56 = vpop.f32.mrb[7].mxu0 }
  0xea   :  { %v864_v18 = vpop.eup %863 }
  0xeb   :  { %218 = vrot.lane.b32.xlu0 %v864_v18, %s921_s8  ;;  %v210_v20 = vmul.f32 0.5, %v864_v18  ;;  %v131_v18 = vadd.f32 %v1010_v11, %v1005_v7 }
  0xed   :  { %v211_v21 = vadd.f32 0.5, %v210_v20 }
  0xef   :  { %213 = vrot.lane.b32.xlu0 %v151_v19, %s921_s8 }
 0x15d   :  { %v219_v22 = vpop.permute.xlu0 %218 }
 0x15e   :  { %v221_v23 = vmul.f32 %v219_v22, %v211_v21 }
 0x160   :  { %223 = vrot.lane.b32.xlu1 %v221_v23, %s921_s8 }
 0x161   :  { %v214_v24 = vpop.permute.xlu0 %213 }
 0x162   :  { %v216_v25 = vmul.f32 %v214_v24, %v211_v21 }
 0x1d2   :  { %v224_v26 = vpop.permute.xlu1 %223 }
 0x1d3   :  { %v226_v27 = vadd.f32 %v224_v26, %v216_v25 }
 0x1d5   :  { %865 = vtanh.f32 %v226_v27 }
 0x1df   :  { %v866_v28 = vpop.eup %865 }
 0x1e0   :  { %229 = vrot.lane.b32.xlu1 %v866_v28, %s921_s8 }
 0x252   :  { %v230_v29 = vpop.permute.xlu1 %229 }
 0x253   :  { %v232_v30 = vmul.f32 %v230_v29, %v211_v21 }
 0x255   :  { %v233_v31 = vpack.c.bf16 %v232_v30, %v232_v30 }
 0x257   :  { %235 = vrot.lane.b32.xlu0 %v233_v31, %s922_s5 }
 0x2c9   :  { %v236_v32 = vpop.permute.xlu0 %235 }
 0x2ca   :  { %800 = vmatmul.mubr.msk.bf16.vlgmr.msra.gmra.mrb[4].mxu1 %vm164_vm2, %v236_v32 }
 0x2cb   :  { %812 = vmatpush3.bf16.msra.mxu1 %v966_v2  ;;  %815 = vmatprep.mubr.msk.bf16.mxu1 %vm920_vm1, %v919_v1 }
 0x2cc   :  { %813 = vmatprep.subr.bf16.mxu1 %v919_v1 }
 0x2cf   :  { %814 = vmatpush3.bf16.msra.mxu1 %v980_v5 }
 0x2d0   :  { %827 = vmatprep.subr.bf16.mxu1 %v919_v1 }
 0x39d   :  { %v274_v34 = vpop.f32.mrb[4].mxu1 }
 0x39e   :  { %v280_v35 = vadd.f32 %v274_v34, %v123_v33  ;;  %v801_v36 = vpop.f32.mrb[5].mxu1 }
 0x39f   :  { %v277_v37 = vpop.f32.mrb[6].mxu1  ;;  %v136_v36 = vadd.f32 %v1005_v7, %v1044_v54 }
 0x3a0   :  { %867 = vtanh.f32 %v280_v35  ;;  %v802_v38 = vpop.f32.mrb[7].mxu1 }
 0x3aa   :  { %v868_v39 = vpop.eup %867 }
 0x3ab   :  { %286 = vrot.lane.b32.xlu1 %v868_v39, %s921_s8  ;;  %v282_v40 = vmul.f32 0.5, %v868_v39 }
 0x3ad   :  { %v283_v41 = vadd.f32 0.5, %v282_v40 }
 0x3af   :  { %v284_v44 = vmul.f32 %v283_v41, %v226_v27 }
 0x41d   :  { %v287_v42 = vpop.permute.xlu1 %286 }
 0x41e   :  { %v289_v43 = vmul.f32 %v287_v42, %v283_v41 }
 0x420   :  { %291 = vrot.lane.b32.xlu0 %v289_v43, %s921_s8 }
 0x492   :  { %v292_v45 = vpop.permute.xlu0 %291 }
 0x493   :  { %v294_v46 = vadd.f32 %v292_v45, %v284_v44 }
 0x495   :  { %869 = vtanh.f32 %v294_v46 }
 0x49f   :  { %v870_v49 = vpop.eup %869 }
 0x4a0   :  { %297 = vrot.lane.b32.xlu1 %v870_v49, %s921_s8 }
 0x512   :  { %v298_v50 = vpop.permute.xlu1 %297 }
 0x513   :  { %v300_v51 = vmul.f32 %v298_v50, %v283_v41 }
 0x515   :  { %v301_v52 = vpack.c.bf16 %v300_v51, %v300_v51 }
 0x517   :  { %303 = vrot.lane.b32.xlu0 %v301_v52, %s922_s5 }
 0x589   :  { %v304_v57 = vpop.permute.xlu0 %303 }
 0x58a   :  { %808 = vmatmul.mubr.msk.bf16.vlgmr.msra.gmra.mrb[8].mxu0 %vm164_vm2, %v304_v57 }
 0x58b   :  { %820 = vmatpush3.bf16.msra.mxu0 %v966_v2  ;;  %823 = vmatprep.mubr.msk.bf16.mxu0 %vm920_vm1, %v919_v1 }
 0x58c   :  { %821 = vmatprep.subr.bf16.mxu0 %v919_v1 }
 0x58f   :  { %822 = vmatpush3.bf16.msra.mxu0 %v980_v5 }
 0x590   :  { %835 = vmatprep.subr.bf16.mxu0 %v919_v1 }
 0x65d   :  { %v342_v59 = vpop.f32.mrb[8].mxu0 }
 0x65e   :  { %v348_v60 = vadd.f32 %v342_v59, %v128_v58  ;;  %v809_v61 = vpop.f32.mrb[9].mxu0  ;;  %v139_v58 = vadd.f32 %v1005_v7, %v1048_v56 }
 0x65f   :  { %v345_v62 = vpop.f32.mrb[10].mxu0 }
 0x660   :  { %871 = vtanh.f32 %v348_v60  ;;  %v810_v63 = vpop.f32.mrb[11].mxu0 }
 0x66a   :  { %v872_v0 = vpop.eup %871 }
 0x66b   :  { %354 = vrot.lane.b32.xlu1 %v872_v0, %s921_s8  ;;  %v350_v3 = vmul.f32 0.5, %v872_v0 }
 0x66d   :  { %v351_v4 = vadd.f32 0.5, %v350_v3 }
 0x66f   :  { %v352_v10 = vmul.f32 %v351_v4, %v294_v46 }
 0x6dd   :  { %v355_v6 = vpop.permute.xlu1 %354 }
 0x6de   :  { %v357_v9 = vmul.f32 %v355_v6, %v351_v4 }
 0x6e0   :  { %359 = vrot.lane.b32.xlu0 %v357_v9, %s921_s8 }
 0x752   :  { %v360_v12 = vpop.permute.xlu0 %359 }
 0x753   :  { %v362_v13 = vadd.f32 %v360_v12, %v352_v10 }
 0x755   :  { %873 = vtanh.f32 %v362_v13 }
 0x75f   :  { %v874_v8 = vpop.eup %873 }
 0x760   :  { %365 = vrot.lane.b32.xlu1 %v874_v8, %s921_s8 }
 0x7d2   :  { %v366_v14 = vpop.permute.xlu1 %365 }
 0x7d3   :  { %v368_v15 = vmul.f32 %v366_v14, %v351_v4  ;;  %v144_v14 = vadd.f32 %v1042_v53, %v1005_v7 }
 0x7d5   :  { %v369_v16 = vpack.c.bf16 %v368_v15, %v368_v15 }
 0x7d7   :  { %371 = vrot.lane.b32.xlu0 %v369_v16, %s922_s5 }
 0x849   :  { %v372_v17 = vpop.permute.xlu0 %371 }
 0x84a   :  { %816 = vmatmul.mubr.msk.bf16.vlgmr.msra.gmra.mrb[8].mxu1 %vm164_vm2, %v372_v17 }
 0x84b   :  { %828 = vmatpush3.bf16.msra.mxu1 %v966_v2  ;;  %831 = vmatprep.mubr.msk.bf16.mxu1 %vm920_vm1, %v919_v1 }
 0x84c   :  { %829 = vmatprep.subr.bf16.mxu1 %v919_v1 }
 0x84f   :  { %830 = vmatpush3.bf16.msra.mxu1 %v980_v5 }
 0x850   :  { %843 = vmatprep.subr.bf16.mxu1 %v919_v1 }
 0x91d   :  { %v410_v19 = vpop.f32.mrb[8].mxu1 }
 0x91e   :  { %v416_v20 = vadd.f32 %v410_v19, %v131_v18  ;;  %v817_v21 = vpop.f32.mrb[9].mxu1 }
 0x91f   :  { %v413_v22 = vpop.f32.mrb[10].mxu1 }
 0x920   :  { %875 = vtanh.f32 %v416_v20  ;;  %v818_v23 = vpop.f32.mrb[11].mxu1 }
 0x92a   :  { %v876_v24 = vpop.eup %875 }
 0x92b   :  { %422 = vrot.lane.b32.xlu1 %v876_v24, %s921_s8  ;;  %v418_v25 = vmul.f32 0.5, %v876_v24 }
 0x92d   :  { %v419_v26 = vadd.f32 0.5, %v418_v25 }
 0x92f   :  { %v420_v29 = vmul.f32 %v419_v26, %v362_v13 }
 0x99d   :  { %v423_v27 = vpop.permute.xlu1 %422 }
 0x99e   :  { %v425_v28 = vmul.f32 %v423_v27, %v419_v26 }
 0x9a0   :  { %427 = vrot.lane.b32.xlu0 %v425_v28, %s921_s8 }
 0xa12   :  { %v428_v30 = vpop.permute.xlu0 %427 }
 0xa13   :  { %v430_v31 = vadd.f32 %v428_v30, %v420_v29 }
 0xa15   :  { %877 = vtanh.f32 %v430_v31 }
 0xa1f   :  { %v878_v11 = vpop.eup %877 }
 0xa20   :  { %433 = vrot.lane.b32.xlu1 %v878_v11, %s921_s8  ;;  %v147_v11 = vadd.f32 %v1046_v55, %v1005_v7 }
 0xa92   :  { %v434_v32 = vpop.permute.xlu1 %433 }
 0xa93   :  { %v436_v33 = vmul.f32 %v434_v32, %v419_v26 }
 0xa95   :  { %v437_v34 = vpack.c.bf16 %v436_v33, %v436_v33 }
 0xa97   :  { %439 = vrot.lane.b32.xlu0 %v437_v34, %s922_s5 }
 0xb09   :  { %v440_v35 = vpop.permute.xlu0 %439 }
 0xb0a   :  { %824 = vmatmul.mubr.msk.bf16.vlgmr.msra.gmra.mrb[12].mxu0 %vm164_vm2, %v440_v35 }
 0xb0b   :  { %836 = vmatpush3.bf16.msra.mxu0 %v966_v2  ;;  %839 = vmatprep.mubr.msk.bf16.mxu0 %vm920_vm1, %v919_v1 }
 0xb0c   :  { %837 = vmatprep.subr.bf16.mxu0 %v919_v1 }
 0xb0f   :  { %838 = vmatpush3.bf16.msra.mxu0 %v980_v5 }
 0xbdd   :  { %v478_v37 = vpop.f32.mrb[12].mxu0 }
 0xbde   :  { %v484_v38 = vadd.f32 %v478_v37, %v136_v36  ;;  %v825_v39 = vpop.f32.mrb[13].mxu0 }
 0xbdf   :  { %v481_v40 = vpop.f32.mrb[14].mxu0 }
 0xbe0   :  { %879 = vtanh.f32 %v484_v38  ;;  %v826_v41 = vpop.f32.mrb[15].mxu0 }
 0xbea   :  { %v880_v42 = vpop.eup %879 }
 0xbeb   :  { %490 = vrot.lane.b32.xlu1 %v880_v42, %s921_s8  ;;  %v486_v43 = vmul.f32 0.5, %v880_v42 }
 0xbed   :  { %v487_v44 = vadd.f32 0.5, %v486_v43 }
 0xbef   :  { %v488_v47 = vmul.f32 %v487_v44, %v430_v31 }
 0xc5d   :  { %v491_v45 = vpop.permute.xlu1 %490 }
 0xc5e   :  { %v493_v46 = vmul.f32 %v491_v45, %v487_v44 }
 0xc60   :  { %495 = vrot.lane.b32.xlu0 %v493_v46, %s921_s8 }
 0xcd2   :  { %v496_v48 = vpop.permute.xlu0 %495 }
 0xcd3   :  { %v498_v49 = vadd.f32 %v496_v48, %v488_v47 }
 0xcd5   :  { %881 = vtanh.f32 %v498_v49 }
 0xcdf   :  { %v882_v50 = vpop.eup %881 }
 0xce0   :  { %501 = vrot.lane.b32.xlu1 %v882_v50, %s921_s8 }
 0xd52   :  { %v502_v51 = vpop.permute.xlu1 %501 }
 0xd53   :  { %v504_v52 = vmul.f32 %v502_v51, %v487_v44 }
 0xd55   :  { %v505_v54 = vpack.c.bf16 %v504_v52, %v504_v52 }
 0xd57   :  { %507 = vrot.lane.b32.xlu0 %v505_v54, %s922_s5 }
 0xdc9   :  { %v508_v57 = vpop.permute.xlu0 %507 }
 0xdca   :  { %832 = vmatmul.mubr.msk.bf16.vlgmr.msra.gmra.mrb[12].mxu1 %vm164_vm2, %v508_v57 }
 0xdcb   :  { %844 = vmatpush3.bf16.msra.mxu1 %v966_v2  ;;  %847 = vmatprep.mubr.msk.bf16.mxu1 %vm920_vm1, %v919_v1 }
 0xdcc   :  { %845 = vmatprep.subr.bf16.mxu1 %v919_v1 }
 0xdcf   :  { %846 = vmatpush3.bf16.msra.mxu1 %v980_v5 }
 0xe9d   :  { %v546_v59 = vpop.f32.mrb[12].mxu1 }
 0xe9e   :  { %v552_v60 = vadd.f32 %v546_v59, %v139_v58  ;;  %v833_v61 = vpop.f32.mrb[13].mxu1 }
 0xe9f   :  { %v549_v62 = vpop.f32.mrb[14].mxu1 }
 0xea0   :  { %883 = vtanh.f32 %v552_v60  ;;  %v834_v63 = vpop.f32.mrb[15].mxu1 }
 0xeaa   :  { %v884_v0 = vpop.eup %883 }
 0xeab   :  { %558 = vrot.lane.b32.xlu1 %v884_v0, %s921_s8  ;;  %v554_v2 = vmul.f32 0.5, %v884_v0 }
 0xead   :  { %v555_v3 = vadd.f32 0.5, %v554_v2 }
 0xeaf   :  { %v556_v1 = vmul.f32 %v555_v3, %v498_v49 }
 0xf1d   :  { %v559_v4 = vpop.permute.xlu1 %558 }
 0xf1e   :  { %v561_v6 = vmul.f32 %v559_v4, %v555_v3 }
 0xf20   :  { %563 = vrot.lane.b32.xlu0 %v561_v6, %s921_s8 }
 0xf92   :  { %v564_v5 = vpop.permute.xlu0 %563 }
 0xf93   :  { %v566_v9 = vadd.f32 %v564_v5, %v556_v1 }
 0xf95   :  { %885 = vtanh.f32 %v566_v9 }
 0xf9f   :  { %v886_v56 = vpop.eup %885 }
 0xfa0   :  { %569 = vrot.lane.b32.xlu1 %v886_v56, %s921_s8 }
0x1012   :  { %v570_v10 = vpop.permute.xlu1 %569 }
0x1013   :  { %v572_v12 = vmul.f32 %v570_v10, %v555_v3 }
0x1015   :  { %v573_v13 = vpack.c.bf16 %v572_v12, %v572_v12 }
0x1017   :  { %575 = vrot.lane.b32.xlu0 %v573_v13, %s922_s5 }
0x1089   :  { %v576_v8 = vpop.permute.xlu0 %575 }
0x108a   :  { %840 = vmatmul.mubr.msk.bf16.vlgmr.msra.gmra.mrb[16].mxu0 %vm164_vm2, %v576_v8 }
0x115d   :  { %v614_v15 = vpop.f32.mrb[16].mxu0 }
0x115e   :  { %v620_v16 = vadd.f32 %v614_v15, %v144_v14  ;;  %v841_v17 = vpop.f32.mrb[17].mxu0 }
0x115f   :  { %v617_v18 = vpop.f32.mrb[18].mxu0 }
0x1160   :  { %887 = vtanh.f32 %v620_v16  ;;  %v842_v19 = vpop.f32.mrb[19].mxu0 }
0x116a   :  { %v888_v20 = vpop.eup %887 }
0x116b   :  { %626 = vrot.lane.b32.xlu1 %v888_v20, %s921_s8  ;;  %v622_v21 = vmul.f32 0.5, %v888_v20 }
0x116d   :  { %v623_v22 = vadd.f32 0.5, %v622_v21 }
0x116f   :  { %v624_v25 = vmul.f32 %v623_v22, %v566_v9 }
0x11dd   :  { %v627_v23 = vpop.permute.xlu1 %626 }
0x11de   :  { %v629_v24 = vmul.f32 %v627_v23, %v623_v22 }
0x11e0   :  { %631 = vrot.lane.b32.xlu0 %v629_v24, %s921_s8 }
0x1252   :  { %v632_v26 = vpop.permute.xlu0 %631 }
0x1253   :  { %v634_v27 = vadd.f32 %v632_v26, %v624_v25 }
0x1255   :  { %889 = vtanh.f32 %v634_v27 }
0x125f   :  { %v890_v53 = vpop.eup %889 }
0x1260   :  { %637 = vrot.lane.b32.xlu1 %v890_v53, %s921_s8 }
0x12d2   :  { %v638_v28 = vpop.permute.xlu1 %637 }
0x12d3   :  { %v640_v29 = vmul.f32 %v638_v28, %v623_v22 }
0x12d5   :  { %v641_v30 = vpack.c.bf16 %v640_v29, %v640_v29 }
0x12d7   :  { %643 = vrot.lane.b32.xlu0 %v641_v30, %s922_s5 }
0x1349   :  { %v644_v31 = vpop.permute.xlu0 %643 }
0x134a   :  { %848 = vmatmul.mubr.msk.bf16.vlgmr.msra.gmra.mrb[16].mxu1 %vm164_vm2, %v644_v31 }
0x141d   :  { %v682_v32 = vpop.f32.mrb[16].mxu1 }
0x141e   :  { %v688_v33 = vadd.f32 %v682_v32, %v147_v11  ;;  %v849_v34 = vpop.f32.mrb[17].mxu1 }
0x141f   :  { %v685_v35 = vpop.f32.mrb[18].mxu1 }
0x1420   :  { %891 = vtanh.f32 %v688_v33  ;;  %v850_v36 = vpop.f32.mrb[19].mxu1 }
0x142a   :  { %v892_v37 = vpop.eup %891 }
0x142b   :  { %694 = vrot.lane.b32.xlu1 %v892_v37, %s921_s8  ;;  %v690_v38 = vmul.f32 0.5, %v892_v37 }
0x142d   :  { %v691_v39 = vadd.f32 0.5, %v690_v38 }
0x142f   :  { %v692_v42 = vmul.f32 %v691_v39, %v634_v27 }
0x149d   :  { %v695_v40 = vpop.permute.xlu1 %694 }
0x149e   :  { %v697_v41 = vmul.f32 %v695_v40, %v691_v39 }
0x14a0   :  { %699 = vrot.lane.b32.xlu0 %v697_v41, %s921_s8 }
0x1512   :  { %v700_v43 = vpop.permute.xlu0 %699 }
0x1513   :  { %v702_v44 = vadd.f32 %v700_v43, %v692_v42 }
0x1515   :  { %893 = vtanh.f32 %v702_v44 }
0x151f   :  { %v894_v7 = vpop.eup %893 }
0x1520   :  { %705 = vrot.lane.b32.xlu1 %v894_v7, %s921_s8 }
0x1592   :  { %v706_v55 = vpop.permute.xlu1 %705 }
0x1593   :  { %v708_v45 = vmul.f32 %v706_v55, %v691_v39 }
0x1595   :  { %710 = vrot.lane.b32.xlu0 %v708_v45, %s922_s5 }
0x1607   :  { %v711_v46 = vpop.permute.xlu0 %710 }
0x1608   :  { %713 = vst.msk [vmem:[#allocation2] sm:$0xff] %vm164_vm2, %v711_v46 }
0x1609   :  { %906 = shalt.err (!%p903_p4)
}
0x160a   :  { %s907_s18 = scalar_lea.hbm %s1133_s6, 128 }
0x160b   :  { %p908_p5 = scmp.ne.s32.totalorder %s1133_s6, %s907_s18  ;;  %p911_p6 = scmp.lt.u32.totalorder %s907_s18, %s1133_s6 }
0x160d   :  { %p913_p7 = pnand %p911_p6, %p908_p5 }
0x160f   :  { %916 = shalt.err (!%p913_p7)
}
0x1610   :  { %723 = dma.vmem_to_hbm [thread:$0]  %s721_s14, 128, %s1133_s6, [#allocation3]  }
0x1611   :  { %917 = dma.done.wait [#allocation3], 128  }
0x1612   :  { %918 = vsyncadd [#allocation3], 4294967168 }
0x1613   :  { %727 = vsyncpa [#allocation3], 1 }

</bundles_post_ra>
